<compile_context>
chip_gen: v6e
topology: v6e:2x2x1
jax: 0.10.0
libtpu: 0.0.40
codegen_flags: <defaults>
</compile_context>

<pallas_src>
import jax
import jax.numpy as jnp
from jax.experimental import pallas as pl
from jax.experimental.pallas import tpu as pltpu


_TINY_BYTES = 2 * 1024 * 1024              # whole problem in one grid step
_MEDIUM_PER_BATCH_BYTES = 6 * 1024 * 1024  # per-batch slabs, grid over B

# Deeper input buffering for the tiled path (hides exposed HBM DMA on v6e).
_BUFFERED_IN = {"pipeline_mode": pl.Buffered(3)} if hasattr(pl, "Buffered") else {}


def _round_up(x, m):
    return ((x + m - 1) // m) * m


def _pick_tile(dim, candidates):
    for c in candidates:
        if dim >= c:
            return c
    return candidates[-1]


def _cost(B, M, K, N, in_itemsize, out_itemsize):
    return pl.CostEstimate(
        flops=2 * B * M * K * N,
        transcendentals=0,
        bytes_accessed=(B * M * K + B * K * N) * in_itemsize
        + B * M * N * out_itemsize,
    )


# ----------------------------------------------------------------------------
# Tiny path: whole bmm in one grid step (one DMA per operand, zero step
# overhead) — only for problems <= 2 MiB.
# ----------------------------------------------------------------------------
def _bmm_whole_kernel(x1_ref, x2_ref, out_ref):
    out_ref[...] = jnp.einsum(
        "bmk,bkn->bmn",
        x1_ref[...],
        x2_ref[...],
        preferred_element_type=jnp.float32,
    ).astype(out_ref.dtype)


# ----------------------------------------------------------------------------
# Medium path: grid over B, full M/K/N per batch (double-buffered pipelining,
# batches shardable across v7x's two TensorCores).
# ----------------------------------------------------------------------------
def _bmm_batch_kernel(x1_ref, x2_ref, out_ref):
    out_ref[0] = jnp.dot(
        x1_ref[0], x2_ref[0], preferred_element_type=jnp.float32
    ).astype(out_ref.dtype)


# ----------------------------------------------------------------------------
# Tiled path: canonical (B, M/tm, N/tn, K/tk) bmm, K last + 'arbitrary'.
# f32 output: accumulate directly into the resident output block.
# ----------------------------------------------------------------------------
def _bmm_tiled_kernel_f32out(x1_ref, x2_ref, out_ref):
    part = jnp.dot(x1_ref[0], x2_ref[0], preferred_element_type=jnp.float32)

    @pl.when(pl.program_id(3) == 0)
    def _():
        out_ref[0] = part

    @pl.when(pl.program_id(3) != 0)
    def _():
        out_ref[0] += part


def _bmm_tiled_kernel_acc(x1_ref, x2_ref, out_ref, acc_ref):
    @pl.when(pl.program_id(3) == 0)
    def _():
        acc_ref[...] = jnp.zeros_like(acc_ref)

    acc_ref[...] += jnp.dot(
        x1_ref[0], x2_ref[0], preferred_element_type=jnp.float32
    )

    @pl.when(pl.program_id(3) == pl.num_programs(3) - 1)
    def _():
        out_ref[0] = acc_ref[...].astype(out_ref.dtype)


def pallas_bmm(x1, x2, *, force_path=None):
    B, M, K = x1.shape
    B2, K2, N = x2.shape
    assert B == B2 and K == K2, "bmm shape mismatch"

    out_dtype = x1.dtype
    out_shape = jax.ShapeDtypeStruct((B, M, N), out_dtype)
    itemsize = jnp.dtype(x1.dtype).itemsize
    out_itemsize = jnp.dtype(out_dtype).itemsize
    total_bytes = (B * M * K + B * K * N + B * M * N) * itemsize
    per_batch_bytes = (M * K + K * N + M * N) * itemsize
    cost = _cost(B, M, K, N, itemsize, out_itemsize)

    path = force_path
    if path is None:
        if total_bytes <= _TINY_BYTES:
            path = "tiny"
        elif per_batch_bytes <= _MEDIUM_PER_BATCH_BYTES and B > 1:
            path = "batch"
        else:
            path = "tiled"

    # ---------------- tiny: one grid step, whole arrays resident -------------
    if path == "tiny":
        return pl.pallas_call(
            _bmm_whole_kernel,
            out_shape=out_shape,
            cost_estimate=cost,
        )(x1, x2)

    # ---------------- medium: grid over B, full per-batch blocks -------------
    if path == "batch":
        # TODO(synk): when B is very small and M is large, additionally grid
        # over M to expose more parallel blocks for megacore.
        return pl.pallas_call(
            _bmm_batch_kernel,
            out_shape=out_shape,
            grid_spec=pltpu.PrefetchScalarGridSpec(
                num_scalar_prefetch=0,
                grid=(B,),
                in_specs=[
                    pl.BlockSpec((1, M, K), lambda b: (b, 0, 0)),
                    pl.BlockSpec((1, K, N), lambda b: (b, 0, 0)),
                ],
                out_specs=pl.BlockSpec((1, M, N), lambda b: (b, 0, 0)),
            ),
            compiler_params=pltpu.CompilerParams(
                dimension_semantics=("parallel",),
                vmem_limit_bytes=32 << 20,
            ),
            cost_estimate=cost,
        )(x1, x2)

    # ---------------- large: tiled MXU path (pad-then-tile if ragged) --------
    if itemsize >= 4:
        mn_cands = (512, 256, 128)   # f32: ~8-9 MiB working set at 512^3
        k_cands = (512, 256, 128)
    else:
        mn_cands = (1024, 512, 256, 128)  # bf16/fp16: ~14-20 MiB at 1024 tiles
        k_cands = (1024, 512, 256, 128)

    tm = _pick_tile(M, mn_cands)
    tn = _pick_tile(N, mn_cands)
    tk = _pick_tile(K, k_cands)

    Mp, Np, Kp = _round_up(M, tm), _round_up(N, tn), _round_up(K, tk)
    padded = (Mp != M) or (Np != N) or (Kp != K)
    x1p = x1 if (Mp == M and Kp == K) else jnp.pad(
        x1, ((0, 0), (0, Mp - M), (0, Kp - K)))
    x2p = x2 if (Kp == K and Np == N) else jnp.pad(
        x2, ((0, 0), (0, Kp - K), (0, Np - N)))

    f32_out = jnp.dtype(out_dtype) == jnp.dtype(jnp.float32)
    kernel = _bmm_tiled_kernel_f32out if f32_out else _bmm_tiled_kernel_acc
    scratch = [] if f32_out else [pltpu.VMEM((tm, tn), jnp.float32)]

    out_p = pl.pallas_call(
        kernel,
        out_shape=jax.ShapeDtypeStruct((B, Mp, Np), out_dtype),
        grid_spec=pltpu.PrefetchScalarGridSpec(
            num_scalar_prefetch=0,
            grid=(B, Mp // tm, Np // tn, Kp // tk),
            in_specs=[
                pl.BlockSpec((1, tm, tk), lambda b, i, j, k: (b, i, k),
                             **_BUFFERED_IN),
                pl.BlockSpec((1, tk, tn), lambda b, i, j, k: (b, k, j),
                             **_BUFFERED_IN),
            ],
            out_specs=pl.BlockSpec((1, tm, tn), lambda b, i, j, k: (b, i, j)),
            scratch_shapes=scratch,
        ),
        compiler_params=pltpu.CompilerParams(
            dimension_semantics=("parallel", "parallel", "parallel", "arbitrary"),
            # Below v7x's 64 MiB physical VMEM with ~50% headroom; raises the
            # 16/32 MiB scoped defaults on v5e/v6e/v7x.
            vmem_limit_bytes=40 << 20,
        ),
        cost_estimate=cost,
    )(x1p, x2p)

    return out_p[:, :M, :N] if padded else out_p


def model_forward(x1, x2):
    # Permutes are pure layout/glue ops — plain JAX transposes (no data math).
    v1 = jnp.transpose(x1, (2, 1, 0))
    v2 = jnp.transpose(x2, (0, 2, 1))
    # Batched matmul hot path in Pallas.
    v3 = pallas_bmm(x1, x2)
    return v1, v2, v3


if __name__ == "__main__":
    key = jax.random.PRNGKey(0)
    k1, k2, k3, k4, k5, k6 = jax.random.split(key, 6)

    # ---- small shapes consistent with the forward (valid bmm shapes) --------
    B, M, K, N = 2, 8, 16, 8
    x1 = jax.random.normal(k1, (B, M, K), dtype=jnp.float32)
    x2 = jax.random.normal(k2, (B, K, N), dtype=jnp.float32)

    v1, v2, v3 = model_forward(x1, x2)
    jax.block_until_ready((v1, v2, v3))

    assert v1.shape == (K, M, B)
    assert v2.shape == (B, N, K)
    ref = jnp.einsum("bmk,bkn->bmn", x1, x2)
    assert jnp.allclose(v3, ref, atol=1e-5, rtol=1e-5)
    assert jnp.allclose(v1, jnp.transpose(x1, (2, 1, 0)))
    assert jnp.allclose(v2, jnp.transpose(x2, (0, 2, 1)))

    # ---- exercise the batch-gridded (medium) path ----------------------------
    Bm, Mm, Km, Nm = 4, 128, 256, 128
    a_m = jax.random.normal(k3, (Bm, Mm, Km), dtype=jnp.float32)
    b_m = jax.random.normal(k4, (Km,), dtype=jnp.float32)  # placeholder, replaced below
    b_m = jax.random.normal(k4, (Bm, Km, Nm), dtype=jnp.float32)
    out_m = pallas_bmm(a_m, b_m, force_path="batch")
    jax.block_until_ready(out_m)
    ref_m = jnp.einsum("bmk,bkn->bmn", a_m, b_m)
    assert jnp.allclose(out_m, ref_m, atol=1e-2, rtol=1e-3)

    # ---- exercise the tiled + pad-then-slice path (ragged dims) -------------
    Bt, Mt, Kt, Nt = 2, 300, 200, 260
    a_t = jax.random.normal(k5, (Bt, Mt, Kt), dtype=jnp.float32)
    b_t = jax.random.normal(k6, (Bt, Kt, Nt), dtype=jnp.float32)
    out_t = pallas_bmm(a_t, b_t, force_path="tiled")
    jax.block_until_ready(out_t)
    assert out_t.shape == (Bt, Mt, Nt)
    ref_t = jnp.einsum("bmk,bkn->bmn", a_t, b_t)
    assert jnp.allclose(out_t, ref_t, atol=1e-2, rtol=1e-3)

    print("KERNEL_OK")
</pallas_src>

<mosaic_0001>
module attributes {stable_mosaic.version = 11 : i64} {
  func.func @_bmm_whole_kernel(%arg0: memref<2x8x16xf32, #tpu.memory_space<vmem>>, %arg1: memref<2x16x8xf32, #tpu.memory_space<vmem>>, %arg2: memref<2x8x8xf32, #tpu.memory_space<vmem>>) attributes {dimension_semantics = [], scalar_prefetch = 0 : i64, scratch_operands = 0 : i64, tpu.core_type = #tpu.core_type<tc>} {
    %c0 = arith.constant 0 : index
    %c0_0 = arith.constant 0 : index
    %c0_1 = arith.constant 0 : index
    %0 = vector.load %arg0[%c0, %c0_0, %c0_1] : memref<2x8x16xf32, #tpu.memory_space<vmem>>, vector<2x8x16xf32>
    %c0_2 = arith.constant 0 : index
    %c0_3 = arith.constant 0 : index
    %c0_4 = arith.constant 0 : index
    %1 = vector.load %arg1[%c0_2, %c0_3, %c0_4] : memref<2x16x8xf32, #tpu.memory_space<vmem>>, vector<2x16x8xf32>
    "tpu.trace_start"() <{level = 10 : i32, message = "bmk,bkn->bmn"}> : () -> ()
    %cst = arith.constant dense<0.000000e+00> : vector<2x8x8xf32>
    %2 = tpu.matmul %0, %1, %cst {dimension_numbers = #tpu.dot_dimension_numbers<[2], [1], [1], [2], [0, 0, 0, 1, 1, 2], [0], [0]>} : vector<2x8x16xf32>, vector<2x16x8xf32>, vector<2x8x8xf32> -> vector<2x8x8xf32>
    "tpu.trace_stop"() : () -> ()
    %c0_5 = arith.constant 0 : index
    %c0_6 = arith.constant 0 : index
    %c0_7 = arith.constant 0 : index
    %3 = vector.load %arg2[%c0_5, %c0_6, %c0_7] : memref<2x8x8xf32, #tpu.memory_space<vmem>>, vector<2x8x8xf32>
    tpu.vector_store %arg2[%c0_5, %c0_6, %c0_7], %2 {strides = array<i32>} : memref<2x8x8xf32, #tpu.memory_space<vmem>>, vector<2x8x8xf32>,
    return
  }
}

</mosaic_0001>

<bundles_post_ra>
// kernel: tpu_custom_call.1
= control target key start
LH: loop header
LB: loop body
LE: loop exit
PB: predicated region body
PF: predicated region fallthrough
CT: control target
= control target key end

     0   :  { %v233_v2 = vmov 0.0   ;;  %s274_s0 = inlined_call_operand.vmem [shape: f32[2,8,16], index: 0, kind: input, shape index: {}]   ;;  %s275_s1 = inlined_call_operand.vmem [shape: f32[2,16,8], index: 1, kind: input, shape index: {}]   ;;  %s276_s2 = inlined_call_operand.hbm [shape: f32[2,8,8], index: 2, kind: output, shape index: {}]  }
   0x1   :  { %v15_v0 = vld [vmem:[%s275_s1 + $0x8] sm:$0xff]  ;;  %v17_v1 = vld [vmem:[%s275_s1 + $0x18] sm:$0xff]  ;;  %192 = vmatprep.subr.mxu0 %v233_v2  ;;  %199 = vmatprep.subr.mxu1 %v233_v2  ;;  %v14_v3 = vld [vmem:[%s275_s1] sm:$0xff] }
   0x2   :  { %193 = vmatpush3.msra.mxu0 %v15_v0  ;;  %200 = vmatpush3.msra.mxu1 %v17_v1  ;;  %v16_v4 = vld [vmem:[%s275_s1 + $0x10] sm:$0xff] }
   0x3   :  { %7 = vsyncpa [#allocation3], 0  ;;  %194 = vmatprep.subr.mxu0 %v233_v2  ;;  %201 = vmatprep.subr.mxu1 %v233_v2  ;;  %v12_v5 = vld [vmem:[%s274_s0] sm:$0xff]  ;;  %vm18_vm0 = vcmask 130048   ;;  %v13_v6 = vld [vmem:[%s274_s0 + $0x8] sm:$0xff]  ;;  %vm234_vm1 = vmmov 0  }
   0x4   :  { %195 = vmatpush3.msra.mxu0 %v14_v3  ;;  %196 = vmatprep.mubr.msk.f32.mxu0 %vm234_vm1, %v233_v2  ;;  %s235_s1 = smov [#allocation2]   ;;  %vm165_vm2 = vcmask 64512  }
   0x5   :  { %202 = vmatpush3.msra.mxu1 %v16_v4  ;;  %203 = vmatprep.mubr.msk.f32.mxu1 %vm234_vm1, %v233_v2  ;;  %s173_s21 = sshll.u32 %s235_s1, 4  ;;  %s174_s21 = int_to_ptr.vmem [resolvable:$true] %s173_s21 }
   0x6   :  { %197 = vmatmul.mubr.msk.f32.vlgmr.msra.gmra.mxu0 %vm18_vm0, %v12_v5  ;;  %204 = vmatmul.mubr.msk.f32.vlgmr.msra.gmra.mxu1 %vm18_vm0, %v13_v6  ;;  %s211_s22 = scalar_lea.vmem %s174_s21, 256  ;;  %p216_p1 = scmp.lt.s32.totalorder %s174_s21, %s174_s21 }
   0x7   :  { %p212_p0 = scmp.ne.s32.totalorder %s174_s21, %s211_s22  ;;  %p217_p2 = scmp.lt.s32.totalorder %s211_s22, %s211_s22 }
   0x9   :  { %p218_p3 = por %p217_p2, %p216_p1 }
   0xb   :  { %p219_p4 = pnand %p218_p3, %p212_p0 }
  0xc6   :  { %v88_v7 = vpop.f32.mrf.mxu0  ;;  %v161_v8 = vpop.f32.mrf.mxu1 }
  0xc7   :  { %166 = vst.msk [vmem:[#allocation2] sm:$0xff] %vm165_vm2, %v88_v7  ;;  %167 = vst.msk [vmem:[#allocation2 + $0x8] sm:$0xff] %vm165_vm2, %v161_v8 }
  0xc8   :  { %v198_v9 = vpop.f32.mrf.mxu0  ;;  %v205_v10 = vpop.f32.mrf.mxu1 }
  0xc9   :  { %222 = shalt.err (!%p219_p4)
}
  0xca   :  { %s236_s0 = smov 128   ;;  %s237_s23 = smov 8  }
  0xcb   :  { %179 = dma.vmem_to_hbm [thread:$0]  %s174_s21, 256, %s276_s2, [#allocation3], %s236_s0, %s236_s0, %s237_s23  }
  0xcc   :  { %231 = dma.done.wait [#allocation3], 256  }
  0xcd   :  { %232 = vsyncadd [#allocation3], 4294967040 }
  0xce   :  { %183 = vsyncpa [#allocation3], 1 }

</bundles_post_ra>
